<compile_context>
chip_gen: v7x
topology: tpu7x:2x2x1
jax: 0.10.0
libtpu: 0.0.40
codegen_flags: <defaults>
</compile_context>

<pallas_src>
import functools

import jax
import jax.numpy as jnp
from jax.experimental import pallas as pl
from jax.experimental.pallas import tpu as pltpu


def _round_up(x, m):
    return (x + m - 1) // m * m


def output_kernel(h_ref, w_ref, b_ref, res_ref, gamma_ref, beta_ref, o_ref, *,
                  eps: float, h_valid: int):
    # dense: hidden_states @ W   (MXU matmul, f32 accumulation)
    x = jnp.dot(h_ref[...], w_ref[...], preferred_element_type=jnp.float32)
    x = x + b_ref[...].astype(jnp.float32)            # bias (1, Hp) broadcast
    # dropout is identity in eval mode
    # TODO(synk): training-mode dropout (Bernoulli mask via pltpu.prng_random_bits) not implemented.
    x = x + res_ref[...].astype(jnp.float32)          # residual add

    hp = x.shape[-1]
    if h_valid == hp:
        # No feature padding: plain LayerNorm over the last dim.
        u = jnp.mean(x, axis=-1, keepdims=True)
        d = x - u
        s = jnp.mean(d * d, axis=-1, keepdims=True)
    else:
        # Padded feature columns of x are exactly zero (weight cols, bias and
        # residual are zero-padded), so sums over the padded axis equal sums
        # over the valid columns; only (x - u) needs masking.
        inv_h = 1.0 / float(h_valid)
        mask = jax.lax.broadcasted_iota(jnp.int32, (1, hp), 1) < h_valid
        u = jnp.sum(x, axis=-1, keepdims=True) * inv_h
        d = jnp.where(mask, x - u, 0.0)
        s = jnp.sum(d * d, axis=-1, keepdims=True) * inv_h

    xn = d * jax.lax.rsqrt(s + eps)
    y = (gamma_ref[...].astype(jnp.float32) * xn
         + beta_ref[...].astype(jnp.float32))
    o_ref[...] = y.astype(o_ref.dtype)


def output_forward(hidden_states, input_tensor, weight, bias, gamma, beta,
                   eps=1e-12, compute_dtype=None):
    """hidden_states: (B, S, I), input_tensor: (B, S, H), weight: (I, H)."""
    B, S, I = hidden_states.shape
    H = input_tensor.shape[-1]
    M = B * S

    out_dtype = hidden_states.dtype
    mm_dtype = compute_dtype if compute_dtype is not None else hidden_states.dtype

    # Lane-dense feature dims (multiples of 128).
    Ip = _round_up(I, 128)
    Hp = _round_up(H, 128)

    # Per-generation VMEM budget -> row-tile size.
    try:
        info = pltpu.get_tpu_info()
        vmem_cap = int(getattr(info, "vmem_capacity_bytes", 64 * 1024 * 1024))
    except Exception:
        vmem_cap = 64 * 1024 * 1024  # conservative: v7x per-TC physical VMEM

    in_sz = jnp.dtype(mm_dtype).itemsize
    res_sz = jnp.dtype(input_tensor.dtype).itemsize
    out_sz = jnp.dtype(out_dtype).itemsize

    def vmem_est(tm):
        return (2 * tm * Ip * in_sz          # hidden tile, double-buffered
                + 2 * Ip * Hp * in_sz        # resident weight (2 bufs allocated)
                + 2 * tm * Hp * res_sz       # residual tile, double-buffered
                + 2 * tm * Hp * out_sz       # output tile, double-buffered
                + 6 * Hp * 4)                # bias / gamma / beta

    tm = 512 if vmem_cap >= (100 << 20) else 256   # MXU-friendly row tiles
    while tm > 8 and vmem_est(tm) > vmem_cap - (8 << 20):
        tm //= 2
    tm = max(tm, 8)
    # TODO(synk): very large I (resident (I,H) weight won't fit VMEM) would need a
    # second K grid axis with a VMEM accumulator (init/finalize under pl.when).

    TM = _round_up(M, 8) if M <= tm else tm
    Mp = _round_up(M, TM)

    # Flatten + zero-pad (skip copies entirely when already aligned); padded
    # rows/cols never affect valid outputs.
    h_flat = hidden_states.reshape(M, I).astype(mm_dtype)
    if Mp == M and Ip == I:
        h2 = h_flat
    else:
        h2 = jnp.zeros((Mp, Ip), mm_dtype).at[:M, :I].set(h_flat)

    w_cast = weight.astype(mm_dtype)
    if Ip == I and Hp == H:
        w2 = w_cast
    else:
        w2 = jnp.zeros((Ip, Hp), mm_dtype).at[:I, :H].set(w_cast)

    r_flat = input_tensor.reshape(M, H)
    if Mp == M and Hp == H:
        r2 = r_flat
    else:
        r2 = jnp.zeros((Mp, Hp), input_tensor.dtype).at[:M, :H].set(r_flat)

    def pad_vec(v):
        v = v.reshape(1, H).astype(jnp.float32)
        if Hp == H:
            return v
        return jnp.zeros((1, Hp), jnp.float32).at[:, :H].set(v)

    b2 = pad_vec(bias)
    g2 = pad_vec(gamma)
    be2 = pad_vec(beta)

    kernel = functools.partial(output_kernel, eps=float(eps), h_valid=H)

    vmem_limit = int(min(max(2 * vmem_est(TM), 32 << 20), vmem_cap - (4 << 20)))

    out = pl.pallas_call(
        kernel,
        out_shape=jax.ShapeDtypeStruct((Mp, Hp), out_dtype),
        grid_spec=pltpu.PrefetchScalarGridSpec(
            num_scalar_prefetch=0,
            grid=(Mp // TM,),
            in_specs=[
                pl.BlockSpec((TM, Ip), lambda i: (i, 0)),   # hidden_states tile
                pl.BlockSpec((Ip, Hp), lambda i: (0, 0)),   # dense weight (resident)
                pl.BlockSpec((1, Hp), lambda i: (0, 0)),    # dense bias
                pl.BlockSpec((TM, Hp), lambda i: (i, 0)),   # residual tile
                pl.BlockSpec((1, Hp), lambda i: (0, 0)),    # LayerNorm gamma
                pl.BlockSpec((1, Hp), lambda i: (0, 0)),    # LayerNorm beta
            ],
            out_specs=pl.BlockSpec((TM, Hp), lambda i: (i, 0)),
        ),
        compiler_params=pltpu.CompilerParams(
            dimension_semantics=("parallel",),
            vmem_limit_bytes=vmem_limit,
        ),
    )(h2, w2, b2, r2, g2, be2)

    return out[:M, :H].reshape(B, S, H)


if __name__ == "__main__":
    # Small shapes implied by the forward pass of Output:
    #   hidden_states: (batch, seq, intermediate_size)
    #   input_tensor : (batch, seq, hidden_size)
    batch, seq = 2, 8
    intermediate_size, hidden_size = 64, 32

    key = jax.random.PRNGKey(0)
    k1, k2, k3 = jax.random.split(key, 3)

    hidden_states = jax.random.normal(k1, (batch, seq, intermediate_size),
                                      dtype=jnp.float32)
    input_tensor = jax.random.normal(k2, (batch, seq, hidden_size),
                                     dtype=jnp.float32)

    # Deterministic parameter init (nn.Linear(intermediate, hidden) + LayerNorm).
    # Stored as (I, H) so the kernel does x @ W directly.
    weight = (jax.random.normal(k3, (intermediate_size, hidden_size),
                                dtype=jnp.float32)
              * (1.0 / jnp.sqrt(intermediate_size)))
    bias = jnp.zeros((hidden_size,), dtype=jnp.float32)
    gamma = jnp.ones((hidden_size,), dtype=jnp.float32)
    beta = jnp.zeros((hidden_size,), dtype=jnp.float32)

    out = output_forward(hidden_states, input_tensor, weight, bias, gamma, beta)
    out = jax.block_until_ready(out)

    # Lightweight sanity check against pure-JAX reference.
    x_ref = jnp.einsum('bsi,ih->bsh', hidden_states, weight) + bias + input_tensor
    u = x_ref.mean(-1, keepdims=True)
    s = ((x_ref - u) ** 2).mean(-1, keepdims=True)
    ref = gamma * (x_ref - u) / jnp.sqrt(s + 1e-12) + beta
    assert out.shape == ref.shape
    assert jnp.allclose(out, ref, atol=1e-4, rtol=1e-4)

    print("KERNEL_OK")
</pallas_src>

<mosaic_0001>
module attributes {stable_mosaic.version = 11 : i64} {
  func.func @output_kernel(%arg0: i32, %arg1: memref<16x128xf32, #tpu.memory_space<vmem>>, %arg2: memref<128x128xf32, #tpu.memory_space<vmem>>, %arg3: memref<1x128xf32, #tpu.memory_space<vmem>>, %arg4: memref<16x128xf32, #tpu.memory_space<vmem>>, %arg5: memref<1x128xf32, #tpu.memory_space<vmem>>, %arg6: memref<1x128xf32, #tpu.memory_space<vmem>>, %arg7: memref<16x128xf32, #tpu.memory_space<vmem>>) attributes {dimension_semantics = [#tpu.dimension_semantics<parallel>], iteration_bounds = array<i64: 1>, scalar_prefetch = 0 : i64, scratch_operands = 0 : i64, tpu.core_type = #tpu.core_type<tc>, window_params = [{transform_indices = @transform_0, window_bounds = array<i64: 16, 128>}, {pipeline_mode = #tpu.pipeline_mode<synchronous>, transform_indices = @transform_1, window_bounds = array<i64: 128, 128>}, {pipeline_mode = #tpu.pipeline_mode<synchronous>, transform_indices = @transform_2, window_bounds = array<i64: 1, 128>}, {transform_indices = @transform_3, window_bounds = array<i64: 16, 128>}, {pipeline_mode = #tpu.pipeline_mode<synchronous>, transform_indices = @transform_4, window_bounds = array<i64: 1, 128>}, {pipeline_mode = #tpu.pipeline_mode<synchronous>, transform_indices = @transform_5, window_bounds = array<i64: 1, 128>}, {transform_indices = @transform_6, window_bounds = array<i64: 16, 128>}]} {
    %c0 = arith.constant 0 : index
    %c0_0 = arith.constant 0 : index
    %0 = vector.load %arg1[%c0, %c0_0] : memref<16x128xf32, #tpu.memory_space<vmem>>, vector<16x128xf32>
    %c0_1 = arith.constant 0 : index
    %c0_2 = arith.constant 0 : index
    %1 = vector.load %arg2[%c0_1, %c0_2] : memref<128x128xf32, #tpu.memory_space<vmem>>, vector<128x128xf32>
    %cst = arith.constant dense<0.000000e+00> : vector<16x128xf32>
    %2 = tpu.matmul %0, %1, %cst {dimension_numbers = #tpu.dot_dimension_numbers<[1], [0], [0], [1], [0, 0, 1, 1], [], []>} : vector<16x128xf32>, vector<128x128xf32>, vector<16x128xf32> -> vector<16x128xf32>
    %c0_3 = arith.constant 0 : index
    %c0_4 = arith.constant 0 : index
    %3 = vector.load %arg3[%c0_3, %c0_4] : memref<1x128xf32, #tpu.memory_space<vmem>>, vector<1x128xf32>
    %4 = vector.broadcast %3 : vector<1x128xf32> to vector<16x128xf32>
    %5 = arith.addf %2, %4 : vector<16x128xf32>
    %c0_5 = arith.constant 0 : index
    %c0_6 = arith.constant 0 : index
    %6 = vector.load %arg4[%c0_5, %c0_6] : memref<16x128xf32, #tpu.memory_space<vmem>>, vector<16x128xf32>
    %7 = arith.addf %5, %6 : vector<16x128xf32>
    %8 = tpu.iota {dimensions = array<i32: 1>} : vector<1x128xi32>
    %c32_i32 = arith.constant 32 : i32
    %9 = vector.broadcast %c32_i32 : i32 to vector<1x128xi32>
    %10 = arith.cmpi slt, %8, %9 : vector<1x128xi32>
    %cst_7 = arith.constant dense<0.000000e+00> : vector<16xf32>
    %11 = vector.multi_reduction <add>, %7, %cst_7 [1] : vector<16x128xf32> to vector<16xf32>
    %12 = vector.shape_cast %11 : vector<16xf32> to vector<16x1xf32>
    %cst_8 = arith.constant 3.125000e-02 : f32
    %13 = vector.broadcast %cst_8 : f32 to vector<16x1xf32>
    %14 = arith.mulf %12, %13 : vector<16x1xf32>
    %15 = vector.broadcast %14 : vector<16x1xf32> to vector<16x128xf32>
    %16 = arith.subf %7, %15 : vector<16x128xf32>
    %cst_9 = arith.constant 0.000000e+00 : f32
    %17 = vector.shape_cast %10 : vector<1x128xi1> to vector<1x128xi1>
    %18 = vector.broadcast %17 : vector<1x128xi1> to vector<16x128xi1>
    %19 = vector.broadcast %cst_9 : f32 to vector<16x128xf32>
    %20 = arith.select %18, %16, %19 : vector<16x128xi1>, vector<16x128xf32>
    %21 = arith.mulf %20, %20 : vector<16x128xf32>
    %cst_10 = arith.constant dense<0.000000e+00> : vector<16xf32>
    %22 = vector.multi_reduction <add>, %21, %cst_10 [1] : vector<16x128xf32> to vector<16xf32>
    %23 = vector.shape_cast %22 : vector<16xf32> to vector<16x1xf32>
    %cst_11 = arith.constant 3.125000e-02 : f32
    %24 = vector.broadcast %cst_11 : f32 to vector<16x1xf32>
    %25 = arith.mulf %23, %24 : vector<16x1xf32>
    %cst_12 = arith.constant 9.99999996E-13 : f32
    %26 = vector.broadcast %cst_12 : f32 to vector<16x1xf32>
    %27 = arith.addf %25, %26 : vector<16x1xf32>
    %28 = math.rsqrt %27 : vector<16x1xf32>
    %29 = vector.broadcast %28 : vector<16x1xf32> to vector<16x128xf32>
    %30 = arith.mulf %20, %29 : vector<16x128xf32>
    %c0_13 = arith.constant 0 : index
    %c0_14 = arith.constant 0 : index
    %31 = vector.load %arg5[%c0_13, %c0_14] : memref<1x128xf32, #tpu.memory_space<vmem>>, vector<1x128xf32>
    %32 = vector.broadcast %31 : vector<1x128xf32> to vector<16x128xf32>
    %33 = arith.mulf %32, %30 : vector<16x128xf32>
    %c0_15 = arith.constant 0 : index
    %c0_16 = arith.constant 0 : index
    %34 = vector.load %arg6[%c0_15, %c0_16] : memref<1x128xf32, #tpu.memory_space<vmem>>, vector<1x128xf32>
    %35 = vector.broadcast %34 : vector<1x128xf32> to vector<16x128xf32>
    %36 = arith.addf %33, %35 : vector<16x128xf32>
    %c0_17 = arith.constant 0 : index
    %c0_18 = arith.constant 0 : index
    %37 = vector.load %arg7[%c0_17, %c0_18] : memref<16x128xf32, #tpu.memory_space<vmem>>, vector<16x128xf32>
    tpu.vector_store %arg7[%c0_17, %c0_18], %36 {strides = array<i32>} : memref<16x128xf32, #tpu.memory_space<vmem>>, vector<16x128xf32>,
    return
  }
  func.func @transform_0(%arg0: i32) -> (i32, i32) {
    %c0_i32 = arith.constant 0 : i32
    %c0_i32_0 = arith.constant 0 : i32
    return %arg0, %c0_i32 : i32, i32
  }
  func.func @transform_1(%arg0: i32) -> (i32, i32) {
    %c0_i32 = arith.constant 0 : i32
    %c0_i32_0 = arith.constant 0 : i32
    %c0_i32_1 = arith.constant 0 : i32
    return %c0_i32, %c0_i32_0 : i32, i32
  }
  func.func @transform_2(%arg0: i32) -> (i32, i32) {
    %c0_i32 = arith.constant 0 : i32
    %c0_i32_0 = arith.constant 0 : i32
    %c0_i32_1 = arith.constant 0 : i32
    return %c0_i32, %c0_i32_0 : i32, i32
  }
  func.func @transform_3(%arg0: i32) -> (i32, i32) {
    %c0_i32 = arith.constant 0 : i32
    %c0_i32_0 = arith.constant 0 : i32
    return %arg0, %c0_i32 : i32, i32
  }
  func.func @transform_4(%arg0: i32) -> (i32, i32) {
    %c0_i32 = arith.constant 0 : i32
    %c0_i32_0 = arith.constant 0 : i32
    %c0_i32_1 = arith.constant 0 : i32
    return %c0_i32, %c0_i32_0 : i32, i32
  }
  func.func @transform_5(%arg0: i32) -> (i32, i32) {
    %c0_i32 = arith.constant 0 : i32
    %c0_i32_0 = arith.constant 0 : i32
    %c0_i32_1 = arith.constant 0 : i32
    return %c0_i32, %c0_i32_0 : i32, i32
  }
  func.func @transform_6(%arg0: i32) -> (i32, i32) {
    %c0_i32 = arith.constant 0 : i32
    %c0_i32_0 = arith.constant 0 : i32
    return %arg0, %c0_i32 : i32, i32
  }
}

</mosaic_0001>

<bundles_post_ra>
// kernel: tpu_custom_call.1
= control target key start
LH: loop header
LB: loop body
LE: loop exit
PB: predicated region body
PF: predicated region fallthrough
CT: control target
= control target key end

     0   :  { %11 = vsyncpa [#allocation3], 0  ;;  %s545_s0 = inlined_call_operand.hbm [shape: f32[16,128], index: 0, kind: input, shape index: {}]   ;;  %s546_s1 = inlined_call_operand.hbm [shape: f32[128,128], index: 1, kind: input, shape index: {}]   ;;  %s547_s2 = inlined_call_operand.vmem [shape: f32[1,128], index: 2, kind: input, shape index: {}]   ;;  %s548_s3 = inlined_call_operand.hbm [shape: f32[16,128], index: 3, kind: input, shape index: {}]   ;;  %s549_s4 = inlined_call_operand.vmem [shape: f32[1,128], index: 4, kind: input, shape index: {}]   ;;  %s550_s5 = inlined_call_operand.vmem [shape: f32[1,128], index: 5, kind: input, shape index: {}]   ;;  %s551_s6 = inlined_call_operand.hbm [shape: f32[16,128], index: 6, kind: output, shape index: {}]  }
   0x1   :  { %12 = vsyncpa [#allocation6], 0 }
   0x2   :  { %13 = vsyncpa [#allocation4], 0  ;;  %s428_s21 = smov [#allocation5]   ;;  %s429_s23 = smov [#allocation2]  }
   0x3   :  { %s31_s22 = sshll.u32 %s428_s21, 4  ;;  %s19_s24 = sshll.u32 %s429_s23, 4  ;;  %s32_s22 = int_to_ptr.vmem [resolvable:$true] %s31_s22  ;;  %s469_s24 = int_to_ptr.vmem [resolvable:$true] %s19_s24 }
   0x4   :  { %s334_s27 = scalar_lea.hbm %s546_s1, 2048 }
   0x5   :  { %p335_p0 = scmp.ne.s32.totalorder %s546_s1, %s334_s27  ;;  %p338_p1 = scmp.lt.u32.totalorder %s334_s27, %s546_s1 }
   0x7   :  { %p340_p2 = pnand %p338_p1, %p335_p0 }
   0x9   :  { %343 = shalt.err (!%p340_p2)
}
   0xa   :  { %s344_s8 = scalar_lea.vmem %s32_s22, 2048  ;;  %p349_p4 = scmp.lt.s32.totalorder %s32_s22, %s32_s22 }
   0xb   :  { %p345_p3 = scmp.ne.s32.totalorder %s32_s22, %s344_s8  ;;  %p350_p5 = scmp.lt.s32.totalorder %s344_s8, %s344_s8 }
   0xd   :  { %p351_p6 = por %p350_p5, %p349_p4 }
   0xf   :  { %p352_p7 = pnand %p351_p6, %p345_p3 }
  0x11   :  { %355 = shalt.err (!%p352_p7)
}
  0x12   :  { %s430_s9 = smov 128   ;;  %s431_s10 = smov 8  }
  0x13   :  { %37 = dma.hbm_to_vmem [thread:$0]  %s546_s1, 2048, %s32_s22, [#allocation6], %s430_s9, %s430_s9, %s431_s10  }
  0x14   :  { %s356_s15 = scalar_lea.hbm %s545_s0, 256 }
  0x15   :  { %p357_p8 = scmp.ne.s32.totalorder %s545_s0, %s356_s15  ;;  %p360_p9 = scmp.lt.u32.totalorder %s356_s15, %s545_s0 }
  0x17   :  { %p362_p10 = pnand %p360_p9, %p357_p8 }
  0x19   :  { %365 = shalt.err (!%p362_p10)
}
  0x1a   :  { %s366_s20 = scalar_lea.vmem %s469_s24, 256  ;;  %p371_p12 = scmp.lt.s32.totalorder %s469_s24, %s469_s24 }
  0x1b   :  { %p367_p11 = scmp.ne.s32.totalorder %s469_s24, %s366_s20  ;;  %p372_p13 = scmp.lt.s32.totalorder %s366_s20, %s366_s20 }
  0x1d   :  { %p373_p0 = por %p372_p13, %p371_p12 }
  0x1f   :  { %p374_p1 = pnand %p373_p0, %p367_p11 }
  0x21   :  { %377 = shalt.err (!%p374_p1)
}
  0x22   :  { %25 = dma.hbm_to_vmem [thread:$0]  %s545_s0, 256, %s469_s24, [#allocation3], %s430_s9, %s430_s9, %s431_s10  }
  0x23   :  { %s432_s22 = smov [#allocation7]   ;;  %s378_s27 = scalar_lea.hbm %s548_s3, 256 }
  0x24   :  { %s45_s23 = sshll.u32 %s432_s22, 4  ;;  %p379_p2 = scmp.ne.s32.totalorder %s548_s3, %s378_s27  ;;  %s46_s23 = int_to_ptr.vmem [resolvable:$true] %s45_s23 }
  0x25   :  { %p382_p3 = scmp.lt.u32.totalorder %s378_s27, %s548_s3 }
  0x27   :  { %p384_p4 = pnand %p382_p3, %p379_p2 }
  0x29   :  { %387 = shalt.err (!%p384_p4)
}
  0x2a   :  { %s388_s8 = scalar_lea.vmem %s46_s23, 256  ;;  %p393_p6 = scmp.lt.s32.totalorder %s46_s23, %s46_s23 }
  0x2b   :  { %p389_p5 = scmp.ne.s32.totalorder %s46_s23, %s388_s8  ;;  %p394_p7 = scmp.lt.s32.totalorder %s388_s8, %s388_s8 }
  0x2d   :  { %p395_p8 = por %p394_p7, %p393_p6 }
  0x2f   :  { %p396_p9 = pnand %p395_p8, %p389_p5 }
  0x31   :  { %399 = shalt.err (!%p396_p9)
}
  0x32   :  { %51 = dma.hbm_to_vmem [thread:$0]  %s548_s3, 256, %s46_s23, [#allocation6], %s430_s9, %s430_s9, %s431_s10  }
  0x33   :  { %422 = dma.done.wait [#allocation3], 256  }
  0x34   :  { %423 = vsyncadd [#allocation3], 4294967040 }
  0x35   :  { %424 = dma.done.wait [#allocation6], 2304  }
  0x36   :  { %425 = vsyncadd [#allocation6], 4294964992  ;;  %v67_v0 = vld [vmem:[#allocation5] sm:$0xff]  ;;  %v68_v1 = vld [vmem:[#allocation5 + $0x8] sm:$0xff]  ;;  %v169_v35 = vlaneseq  ;;  %s433_s15 = smov [#allocation8]  }
  0x37   :  { %v69_v2 = vld [vmem:[#allocation5 + $0x10] sm:$0xff]  ;;  %v292_v3 = vpack.c.bf16 %v68_v1, %v67_v0  ;;  %v70_v4 = vld [vmem:[#allocation5 + $0x18] sm:$0xff]  ;;  %v71_v6 = vld [vmem:[#allocation5 + $0x20] sm:$0xff]  ;;  %s223_s16 = sshll.u32 %s433_s15, 4  ;;  %s224_s16 = int_to_ptr.vmem [resolvable:$true] %s223_s16 }
  0x38   :  { %v296_v5 = vpack.c.bf16 %v70_v4, %v69_v2  ;;  %v72_v7 = vld [vmem:[#allocation5 + $0x28] sm:$0xff]  ;;  %v65_v9 = vld [vmem:[#allocation2] sm:$0xff]  ;;  %v74_v11 = vld [vmem:[#allocation5 + $0x38] sm:$0xff]  ;;  %v170_v36 = vand.u32 127, %v169_v35  ;;  %s400_s17 = scalar_lea.vmem %s224_s16, 256  ;;  %p405_p11 = scmp.lt.s32.totalorder %s224_s16, %s224_s16 }
  0x39   :  { %293 = vmatprep.subr.bf16.mxu0 %v292_v3  ;;  %v300_v8 = vpack.c.bf16 %v72_v7, %v71_v6  ;;  %v73_v10 = vld [vmem:[#allocation5 + $0x30] sm:$0xff]  ;;  %289 = vmatprep.mubr.f32.mxu0 %v65_v9  ;;  %v75_v13 = vld [vmem:[#allocation5 + $0x40] sm:$0xff]  ;;  %v76_v14 = vld [vmem:[#allocation5 + $0x48] sm:$0xff]  ;;  %p401_p10 = scmp.ne.s32.totalorder %s224_s16, %s400_s17  ;;  %p406_p12 = scmp.lt.s32.totalorder %s400_s17, %s400_s17 }
  0x3a   :  { %295 = vmatpush3.bf16.msra.mxu0 %v292_v3  ;;  %v304_v12 = vpack.c.bf16 %v74_v11, %v73_v10  ;;  %v308_v15 = vpack.c.bf16 %v76_v14, %v75_v13  ;;  %v77_v16 = vld [vmem:[#allocation5 + $0x50] sm:$0xff]  ;;  %v78_v17 = vld [vmem:[#allocation5 + $0x58] sm:$0xff]  ;;  %v79_v19 = vld [vmem:[#allocation5 + $0x60] sm:$0xff]  ;;  %vm171_vm0 = vcmp.lt.s32.totalorder %v170_v36, 32 }
  0x3b   :  { %297 = vmatprep.subr.bf16.mxu0 %v296_v5  ;;  %v312_v18 = vpack.c.bf16 %v78_v17, %v77_v16  ;;  %v80_v20 = vld [vmem:[#allocation5 + $0x68] sm:$0xff]  ;;  %v81_v22 = vld [vmem:[#allocation5 + $0x70] sm:$0xff]  ;;  %v82_v23 = vld [vmem:[#allocation5 + $0x78] sm:$0xff]  ;;  %p407_p13 = por %p406_p12, %p405_p11 }
  0x3c   :  { %v316_v21 = vpack.c.bf16 %v80_v20, %v79_v19  ;;  %v320_v24 = vpack.c.bf16 %v82_v23, %v81_v22  ;;  %v66_v25 = vld [vmem:[#allocation2 + $0x8] sm:$0xff]  ;;  %v236_v26 = vld [vmem:[%s547_s2] ss:$0 sm:$0xff]  ;;  %v165_v29 = vld [vmem:[#allocation7] sm:$0xff] }
  0x3d   :  { %v166_v33 = vld [vmem:[#allocation7 + $0x8] sm:$0xff]  ;;  %v237_v54 = vld [vmem:[%s549_s4] ss:$0 sm:$0xff]  ;;  %p408_p0 = pnand %p407_p13, %p401_p10 }
  0x3e   :  { %299 = vmatpush3.bf16.msra.mxu0 %v296_v5  ;;  %v238_v56 = vld [vmem:[%s550_s5] ss:$0 sm:$0xff] }
  0x3f   :  { %301 = vmatprep.subr.bf16.mxu0 %v300_v8 }
  0x42   :  { %303 = vmatpush3.bf16.msra.mxu0 %v300_v8 }
  0x43   :  { %305 = vmatprep.subr.bf16.mxu0 %v304_v12 }
  0x46   :  { %307 = vmatpush3.bf16.msra.mxu0 %v304_v12 }
  0x47   :  { %309 = vmatprep.subr.bf16.mxu0 %v308_v15 }
  0x4a   :  { %311 = vmatpush3.bf16.msra.mxu0 %v308_v15 }
  0x4b   :  { %313 = vmatprep.subr.bf16.mxu0 %v312_v18 }
  0x4e   :  { %315 = vmatpush3.bf16.msra.mxu0 %v312_v18 }
  0x4f   :  { %317 = vmatprep.subr.bf16.mxu0 %v316_v21 }
  0x52   :  { %319 = vmatpush3.bf16.msra.mxu0 %v316_v21 }
  0x53   :  { %321 = vmatprep.subr.bf16.mxu0 %v320_v24 }
  0x56   :  { %323 = vmatpush3.bf16.msra.mxu0 %v320_v24 }
  0x59   :  { %290 = vmatmul.mubr.f32.vlgmr.msra.gmra.mrb[0].mxu0 %v66_v25 }
 0x12c   :  { %v291_v27 = vpop.f32.mrb[0].mxu0 }
 0x12d   :  { %v156_v28 = vpop.f32.mrb[1].mxu0  ;;  %v162_v31 = vadd.f32 %v291_v27, %v236_v26 }
 0x12e   :  { %v157_v30 = vadd.f32 %v236_v26, %v156_v28 }
 0x12f   :  { %v168_v34 = vadd.f32 %v166_v33, %v162_v31 }
 0x130   :  { %v167_v32 = vadd.f32 %v165_v29, %v157_v30 }
 0x132   :  { %172 = vadd.xlane.f32.xlu0 %v167_v32 }
 0x136   :  { %174 = vadd.xlane.f32.xlu0 %v168_v34 }
 0x1bf   :  { %v173_v37 = vpop.xlane.xlu0 %172 }
 0x1c0   :  { %v176_v38 = vmul.f32 0.03125, %v173_v37 }
 0x1c2   :  { %v178_v39 = vsub.f32 %v167_v32, %v176_v38 }
 0x1c3   :  { %v175_v40 = vpop.xlane.xlu0 %174 }
 0x1c4   :  { %v177_v41 = vmul.f32 0.03125, %v175_v40  ;;  %v182_v42 = vsel %vm171_vm0, %v178_v39, 0.0 }
 0x1c5   :  { %v184_v43 = vmul.f32 %v182_v42, %v182_v42 }
 0x1c6   :  { %v179_v44 = vsub.f32 %v168_v34, %v177_v41 }
 0x1c7   :  { %186 = vadd.xlane.f32.xlu1 %v184_v43 }
 0x1c8   :  { %v183_v45 = vsel %vm171_vm0, %v179_v44, 0.0 }
 0x1c9   :  { %v185_v46 = vmul.f32 %v183_v45, %v183_v45 }
 0x1cb   :  { %188 = vadd.xlane.f32.xlu1 %v185_v46 }
 0x254   :  { %v187_v47 = vpop.xlane.xlu1 %186 }
 0x255   :  { %v190_v48 = vmul.f32 0.03125, %v187_v47 }
 0x257   :  { %v192_v49 = vadd.f32 1e-12, %v190_v48 }
 0x258   :  { %v189_v50 = vpop.xlane.xlu1 %188 }
 0x259   :  { %330 = vrsqrt.f32 %v192_v49  ;;  %v191_v51 = vmul.f32 0.03125, %v189_v50 }
 0x25b   :  { %v193_v52 = vadd.f32 1e-12, %v191_v51 }
 0x25d   :  { %332 = vrsqrt.f32 %v193_v52 }
 0x263   :  { %v331_v53 = vpop.eup %330 }
 0x264   :  { %v196_v55 = vmul.f32 %v331_v53, %v182_v42 }
 0x266   :  { %v205_v57 = vmul.f32 %v237_v54, %v196_v55 }
 0x267   :  { %v333_v58 = vpop.eup %332 }
 0x268   :  { %v197_v59 = vmul.f32 %v333_v58, %v183_v45  ;;  %v214_v60 = vadd.f32 %v238_v56, %v205_v57 }
 0x26a   :  { %v206_v61 = vmul.f32 %v237_v54, %v197_v59  ;;  %216 = vst [vmem:[#allocation8] sm:$0xff] %v214_v60 }
 0x26c   :  { %v215_v62 = vadd.f32 %v238_v56, %v206_v61 }
 0x26e   :  { %217 = vst [vmem:[#allocation8 + $0x8] sm:$0xff] %v215_v62 }
 0x26f   :  { %411 = shalt.err (!%p408_p0)
}
 0x270   :  { %s412_s18 = scalar_lea.hbm %s551_s6, 256 }
 0x271   :  { %p413_p1 = scmp.ne.s32.totalorder %s551_s6, %s412_s18  ;;  %p416_p2 = scmp.lt.u32.totalorder %s412_s18, %s551_s6 }
 0x273   :  { %p418_p3 = pnand %p416_p2, %p413_p1 }
 0x275   :  { %421 = shalt.err (!%p418_p3)
}
 0x276   :  { %229 = dma.vmem_to_hbm [thread:$0]  %s224_s16, 256, %s551_s6, [#allocation4], %s430_s9, %s430_s9, %s431_s10  }
 0x277   :  { %426 = dma.done.wait [#allocation4], 256  }
 0x278   :  { %427 = vsyncadd [#allocation4], 4294967040 }
 0x279   :  { %233 = vsyncpa [#allocation3], 1 }
 0x27a   :  { %234 = vsyncpa [#allocation6], 1 }
 0x27b   :  { %235 = vsyncpa [#allocation4], 1 }

</bundles_post_ra>
